<compile_context>
chip_gen: v6e
topology: v6e:2x2x1
jax: 0.10.0
libtpu: 0.0.40
codegen_flags: <defaults>
</compile_context>

<pallas_src>
import jax
import jax.numpy as jnp
from jax import lax
from jax.experimental import pallas as pl
from jax.experimental.pallas import tpu as pltpu


def _encoder_kernel(x_ref, w1_ref, b1_ref, w2_ref, b2_ref, out_ref):
    # MXU: (TB, D_in) bf16 @ (D_in, D_hidden) bf16 -> f32 accumulation.
    h1 = jnp.dot(x_ref[...], w1_ref[...], preferred_element_type=jnp.float32)
    h1 = jnp.maximum(h1 + b1_ref[...], 0.0)                       # bias + ReLU in f32 (VPU)

    # Second (tiny) matmul: bf16 operands, f32 accumulation.
    h2 = jnp.dot(h1.astype(jnp.bfloat16), w2_ref[...],
                 preferred_element_type=jnp.float32)
    h2 = h2 + b2_ref[...]                                         # f32 bias add

    # Fused output: [mu | exp(log_var)] as ONE lane-contiguous store.
    # exp runs on the EUP for the whole vreg; the mu half is selected back.
    d_latent = out_ref.shape[-1] // 2
    lane = lax.broadcasted_iota(jnp.int32, h2.shape, dimension=1)
    out_ref[...] = jnp.where(lane < d_latent, h2, jnp.exp(h2))


def encoder_forward(x_nchw, w1, b1, w2, b2, d_latent):
    """Returns (mu, scale) — the parameters of dist.Normal(mu, exp(log_var))."""
    B = x_nchw.shape[0]
    x_flat = x_nchw.reshape(B, -1)                                # x.view(B, -1)
    d_in = x_flat.shape[1]
    d_hidden = w1.shape[1]
    d_out = w2.shape[1]
    assert d_out == 2 * d_latent

    # bf16 for the matmul operands (dominant HBM traffic); f32 biases.
    x_bf = x_flat.astype(jnp.bfloat16)
    w1_bf = w1.astype(jnp.bfloat16)
    w2_bf = w2.astype(jnp.bfloat16)
    b1_f = b1.reshape(1, d_hidden).astype(jnp.float32)
    b2_f = b2.reshape(1, d_out).astype(jnp.float32)

    # Pad batch to >=8 rows (full sublane groups) and to a multiple of the
    # batch tile; the batch grid axis is "parallel" so v7x's 2nd TC engages
    # when B is large (neutral on v5e/v6e).
    if B >= 256:
        tile_b = 256
    else:
        tile_b = max(8, -(-B // 8) * 8)        # round B up to a multiple of 8
    b_pad = -(-B // tile_b) * tile_b
    if b_pad != B:
        x_bf = jnp.pad(x_bf, ((0, b_pad - B), (0, 0)))
    grid = (b_pad // tile_b,)

    flops = 2 * b_pad * (d_in * d_hidden + d_hidden * d_out)
    bytes_accessed = (x_bf.size * 2 + w1_bf.size * 2 + w2_bf.size * 2
                      + b1_f.size * 4 + b2_f.size * 4 + b_pad * d_out * 4)
    cost = pl.CostEstimate(flops=flops,
                           transcendentals=b_pad * d_out,
                           bytes_accessed=bytes_accessed)

    out = pl.pallas_call(
        _encoder_kernel,
        out_shape=jax.ShapeDtypeStruct((b_pad, d_out), jnp.float32),
        grid=grid,
        in_specs=[
            pl.BlockSpec((tile_b, d_in), lambda i: (i, 0)),       # x tile per grid step
            pl.BlockSpec((d_in, d_hidden), lambda i: (0, 0)),     # weights stay resident
            pl.BlockSpec((1, d_hidden), lambda i: (0, 0)),
            pl.BlockSpec((d_hidden, d_out), lambda i: (0, 0)),
            pl.BlockSpec((1, d_out), lambda i: (0, 0)),
        ],
        out_specs=pl.BlockSpec((tile_b, d_out), lambda i: (i, 0)),
        compiler_params=pltpu.CompilerParams(
            dimension_semantics=("parallel",)),
        cost_estimate=cost,
    )(x_bf, w1_bf, b1_f, w2_bf, b2_f)

    out = out[:B]
    # TODO(synk): torch.distributions.Normal has no Pallas equivalent; we
    # return its parameters (loc=mu, scale=exp(log_var)) instead.
    mu = out[:, :d_latent]
    scale = out[:, d_latent:]
    return mu, scale


if __name__ == "__main__":
    # Small shapes consistent with the module: batch=2, channels=4, spatial=16
    B, C, H, W = 2, 4, 16, 16
    D_IN = C * H * W          # 1024 (flattened)
    D_HIDDEN = 128
    D_LATENT = 16
    D_OUT = 2 * D_LATENT      # encoder produces [mu | log_var]

    key = jax.random.PRNGKey(0)
    kx, k1, k2, k3, k4 = jax.random.split(key, 5)

    x = jax.random.normal(kx, (B, C, H, W), dtype=jnp.float32)
    # Deterministic parameter init (synthetic weights for the MLP encoder).
    w1 = jax.random.normal(k1, (D_IN, D_HIDDEN), dtype=jnp.float32) * 0.02
    b1 = jax.random.normal(k2, (1, D_HIDDEN), dtype=jnp.float32) * 0.01
    w2 = jax.random.normal(k3, (D_HIDDEN, D_OUT), dtype=jnp.float32) * 0.02
    b2 = jax.random.normal(k4, (1, D_OUT), dtype=jnp.float32) * 0.01

    mu, scale = encoder_forward(x, w1, b1, w2, b2, D_LATENT)
    jax.block_until_ready((mu, scale))

    x_flat = x.reshape(B, -1)

    # Reference 1: matched numerics (bf16 matmul operands, f32 accumulation).
    h1_bf = jnp.maximum(
        jnp.dot(x_flat.astype(jnp.bfloat16), w1.astype(jnp.bfloat16),
                preferred_element_type=jnp.float32) + b1, 0.0)
    h2_bf = jnp.dot(h1_bf.astype(jnp.bfloat16), w2.astype(jnp.bfloat16),
                    preferred_element_type=jnp.float32) + b2
    mu_ref_bf = h2_bf[:, :D_LATENT]
    scale_ref_bf = jnp.exp(h2_bf[:, D_LATENT:])
    assert jnp.allclose(mu, mu_ref_bf, atol=1e-3, rtol=1e-3)
    assert jnp.allclose(scale, scale_ref_bf, atol=1e-3, rtol=1e-3)

    # Reference 2: full-f32 PyTorch-equivalent math (looser tol for bf16 weights).
    h_ref = jnp.maximum(x_flat @ w1 + b1, 0.0) @ w2 + b2
    mu_ref = h_ref[:, :D_LATENT]
    scale_ref = jnp.exp(h_ref[:, D_LATENT:])
    assert jnp.allclose(mu, mu_ref, atol=5e-2, rtol=5e-2)
    assert jnp.allclose(scale, scale_ref, atol=5e-2, rtol=5e-2)

    assert mu.shape == (B, D_LATENT) and scale.shape == (B, D_LATENT)

    print("KERNEL_OK")
</pallas_src>

<mosaic_0001>
module attributes {stable_mosaic.version = 11 : i64} {
  func.func @_encoder_kernel(%arg0: i32, %arg1: memref<8x1024xbf16, #tpu.memory_space<vmem>>, %arg2: memref<1024x128xbf16, #tpu.memory_space<vmem>>, %arg3: memref<1x128xf32, #tpu.memory_space<vmem>>, %arg4: memref<128x32xbf16, #tpu.memory_space<vmem>>, %arg5: memref<1x32xf32, #tpu.memory_space<vmem>>, %arg6: memref<8x32xf32, #tpu.memory_space<vmem>>) attributes {dimension_semantics = [#tpu.dimension_semantics<parallel>], iteration_bounds = array<i64: 1>, scalar_prefetch = 0 : i64, scratch_operands = 0 : i64, tpu.core_type = #tpu.core_type<tc>, window_params = [{transform_indices = @transform_0, window_bounds = array<i64: 8, 1024>}, {pipeline_mode = #tpu.pipeline_mode<synchronous>, transform_indices = @transform_1, window_bounds = array<i64: 1024, 128>}, {pipeline_mode = #tpu.pipeline_mode<synchronous>, transform_indices = @transform_2, window_bounds = array<i64: 1, 128>}, {pipeline_mode = #tpu.pipeline_mode<synchronous>, transform_indices = @transform_3, window_bounds = array<i64: 128, 32>}, {pipeline_mode = #tpu.pipeline_mode<synchronous>, transform_indices = @transform_4, window_bounds = array<i64: 1, 32>}, {transform_indices = @transform_5, window_bounds = array<i64: 8, 32>}]} {
    %c0 = arith.constant 0 : index
    %c0_0 = arith.constant 0 : index
    %0 = vector.load %arg1[%c0, %c0_0] : memref<8x1024xbf16, #tpu.memory_space<vmem>>, vector<8x1024xbf16>
    %c0_1 = arith.constant 0 : index
    %c0_2 = arith.constant 0 : index
    %1 = vector.load %arg2[%c0_1, %c0_2] : memref<1024x128xbf16, #tpu.memory_space<vmem>>, vector<1024x128xbf16>
    %cst = arith.constant dense<0.000000e+00> : vector<8x128xf32>
    %2 = tpu.matmul %0, %1, %cst {dimension_numbers = #tpu.dot_dimension_numbers<[1], [0], [0], [1], [0, 0, 1, 1], [], []>} : vector<8x1024xbf16>, vector<1024x128xbf16>, vector<8x128xf32> -> vector<8x128xf32>
    %c0_3 = arith.constant 0 : index
    %c0_4 = arith.constant 0 : index
    %3 = vector.load %arg3[%c0_3, %c0_4] : memref<1x128xf32, #tpu.memory_space<vmem>>, vector<1x128xf32>
    %4 = vector.broadcast %3 : vector<1x128xf32> to vector<8x128xf32>
    %5 = arith.addf %2, %4 : vector<8x128xf32>
    %cst_5 = arith.constant 0.000000e+00 : f32
    %6 = vector.broadcast %cst_5 : f32 to vector<8x128xf32>
    %7 = arith.maximumf %5, %6 : vector<8x128xf32>
    %8 = arith.truncf %7 : vector<8x128xf32> to vector<8x128xbf16>
    %c0_6 = arith.constant 0 : index
    %c0_7 = arith.constant 0 : index
    %9 = vector.load %arg4[%c0_6, %c0_7] : memref<128x32xbf16, #tpu.memory_space<vmem>>, vector<128x32xbf16>
    %cst_8 = arith.constant dense<0.000000e+00> : vector<8x32xf32>
    %10 = tpu.matmul %8, %9, %cst_8 {dimension_numbers = #tpu.dot_dimension_numbers<[1], [0], [0], [1], [0, 0, 1, 1], [], []>} : vector<8x128xbf16>, vector<128x32xbf16>, vector<8x32xf32> -> vector<8x32xf32>
    %c0_9 = arith.constant 0 : index
    %c0_10 = arith.constant 0 : index
    %11 = vector.load %arg5[%c0_9, %c0_10] : memref<1x32xf32, #tpu.memory_space<vmem>>, vector<1x32xf32>
    %12 = vector.broadcast %11 : vector<1x32xf32> to vector<8x32xf32>
    %13 = arith.addf %10, %12 : vector<8x32xf32>
    %14 = tpu.iota {dimensions = array<i32: 1>} : vector<8x32xi32>
    %c16_i32 = arith.constant 16 : i32
    %15 = vector.broadcast %c16_i32 : i32 to vector<8x32xi32>
    %16 = arith.cmpi slt, %14, %15 : vector<8x32xi32>
    %17 = math.exp %13 : vector<8x32xf32>
    %18 = arith.select %16, %13, %17 : vector<8x32xi1>, vector<8x32xf32>
    %c0_11 = arith.constant 0 : index
    %c0_12 = arith.constant 0 : index
    %19 = vector.load %arg6[%c0_11, %c0_12] : memref<8x32xf32, #tpu.memory_space<vmem>>, vector<8x32xf32>
    tpu.vector_store %arg6[%c0_11, %c0_12], %18 {strides = array<i32>} : memref<8x32xf32, #tpu.memory_space<vmem>>, vector<8x32xf32>,
    return
  }
  func.func @transform_0(%arg0: i32) -> (i32, i32) {
    %c0_i32 = arith.constant 0 : i32
    %c0_i32_0 = arith.constant 0 : i32
    return %arg0, %c0_i32 : i32, i32
  }
  func.func @transform_1(%arg0: i32) -> (i32, i32) {
    %c0_i32 = arith.constant 0 : i32
    %c0_i32_0 = arith.constant 0 : i32
    %c0_i32_1 = arith.constant 0 : i32
    return %c0_i32, %c0_i32_0 : i32, i32
  }
  func.func @transform_2(%arg0: i32) -> (i32, i32) {
    %c0_i32 = arith.constant 0 : i32
    %c0_i32_0 = arith.constant 0 : i32
    %c0_i32_1 = arith.constant 0 : i32
    return %c0_i32, %c0_i32_0 : i32, i32
  }
  func.func @transform_3(%arg0: i32) -> (i32, i32) {
    %c0_i32 = arith.constant 0 : i32
    %c0_i32_0 = arith.constant 0 : i32
    %c0_i32_1 = arith.constant 0 : i32
    return %c0_i32, %c0_i32_0 : i32, i32
  }
  func.func @transform_4(%arg0: i32) -> (i32, i32) {
    %c0_i32 = arith.constant 0 : i32
    %c0_i32_0 = arith.constant 0 : i32
    %c0_i32_1 = arith.constant 0 : i32
    return %c0_i32, %c0_i32_0 : i32, i32
  }
  func.func @transform_5(%arg0: i32) -> (i32, i32) {
    %c0_i32 = arith.constant 0 : i32
    %c0_i32_0 = arith.constant 0 : i32
    return %arg0, %c0_i32 : i32, i32
  }
}

</mosaic_0001>

<bundles_post_ra>
// kernel: tpu_custom_call.1
= control target key start
LH: loop header
LB: loop body
LE: loop exit
PB: predicated region body
PF: predicated region fallthrough
CT: control target
= control target key end

     0   :  { %10 = vsyncpa [#allocation3], 0  ;;  %s1298_s0 = inlined_call_operand.vmem [shape: bf16[8,1024], index: 0, kind: input, shape index: {}]   ;;  %s1299_s1 = inlined_call_operand.hbm [shape: bf16[1024,128], index: 1, kind: input, shape index: {}]   ;;  %s1300_s2 = inlined_call_operand.vmem [shape: f32[1,128], index: 2, kind: input, shape index: {}]   ;;  %s1301_s3 = inlined_call_operand.vmem [shape: bf16[128,32], index: 3, kind: input, shape index: {}]   ;;  %s1302_s4 = inlined_call_operand.vmem [shape: f32[1,32], index: 4, kind: input, shape index: {}]   ;;  %s1303_s5 = inlined_call_operand.hbm [shape: f32[8,32], index: 5, kind: output, shape index: {}]  }
   0x1   :  { %11 = vsyncpa [#allocation4], 0  ;;  %s1214_s18 = smov [#allocation2]  }
   0x2   :  { %s19_s19 = sshll.u32 %s1214_s18, 4  ;;  %s20_s19 = int_to_ptr.vmem [resolvable:$true] %s19_s19 }
   0x3   :  { %s1178_s20 = scalar_lea.vmem %s20_s19, 8192  ;;  %p1183_p1 = scmp.lt.s32.totalorder %s20_s19, %s20_s19 }
   0x4   :  { %p1179_p0 = scmp.ne.s32.totalorder %s20_s19, %s1178_s20  ;;  %p1184_p2 = scmp.lt.s32.totalorder %s1178_s20, %s1178_s20 }
   0x6   :  { %p1185_p3 = por %p1184_p2, %p1183_p1 }
   0x8   :  { %p1186_p4 = pnand %p1185_p3, %p1179_p0 }
   0xa   :  { %1189 = shalt.err (!%p1186_p4)
}
   0xb   :  { %s1215_s21 = smov 64   ;;  %s1216_s22 = smov 4  }
   0xc   :  { %25 = dma.hbm_to_vmem [thread:$0]  %s1299_s1, 8192, %s20_s19, [#allocation3], %s1215_s21, %s1215_s21, %s1216_s22  }
   0xd   :  { %1210 = dma.done.wait [#allocation3], 8192  }
   0xe   :  { %1211 = vsyncadd [#allocation3], 4294959104  ;;  %v1088_v0 = vld [vmem:[#allocation2 + $0x78] sm:$0xff]   ;;  %v1092_v4 = vld [vmem:[#allocation2 + $0x70] sm:$0xff]   ;;  %vm1218_vm0 = vmmov 0   ;;  %s1219_s24 = smov [#allocation5]  }
   0xf   :  { %v1089_v1 = vld [vmem:[#allocation2 + $0xf8] sm:$0xff]   ;;  %965 = vmatprep.subr.bf16.mxu0 %v1088_v0  ;;  %v1093_v5 = vld [vmem:[#allocation2 + $0xf0] sm:$0xff]   ;;  %v1096_v8 = vld [vmem:[#allocation2 + $0x68] sm:$0xff]   ;;  %s874_s1 = sshll.u32 %s1219_s24, 4  ;;  %vm866_vm2 = vcmask 261120   ;;  %s875_s1 = int_to_ptr.vmem [resolvable:$true] %s874_s1 }
  0x10   :  { %v1090_v2 = vld [vmem:[#allocation2 + $0x38] sm:$0xff]   ;;  %987 = vmatprep.subr.bf16.mxu1 %v1089_v1  ;;  %v1094_v6 = vld [vmem:[#allocation2 + $0x30] sm:$0xff]   ;;  %v1097_v9 = vld [vmem:[#allocation2 + $0xe8] sm:$0xff]   ;;  %s1190_s25 = scalar_lea.vmem %s875_s1, 128  ;;  %p1195_p6 = scmp.lt.s32.totalorder %s875_s1, %s875_s1 }
  0x11   :  { %v1091_v3 = vld [vmem:[#allocation2 + $0xb8] sm:$0xff]   ;;  %966 = vmatpush3.bf16.msra.mxu0 %v1090_v2  ;;  %v1095_v7 = vld [vmem:[#allocation2 + $0xb0] sm:$0xff]   ;;  %v1098_v10 = vld [vmem:[#allocation2 + $0x28] sm:$0xff]   ;;  %p1191_p5 = scmp.ne.s32.totalorder %s875_s1, %s1190_s25  ;;  %p1196_p7 = scmp.lt.s32.totalorder %s1190_s25, %s1190_s25 }
  0x12   :  { %988 = vmatpush3.bf16.msra.mxu1 %v1091_v3  ;;  %967 = vmatprep.subr.bf16.mxu0 %v1092_v4  ;;  %v1099_v11 = vld [vmem:[#allocation2 + $0xa8] sm:$0xff]   ;;  %v1100_v12 = vld [vmem:[#allocation2 + $0x60] sm:$0xff]   ;;  %v1104_v16 = vld [vmem:[#allocation2 + $0x58] sm:$0xff]  }
  0x13   :  { %989 = vmatprep.subr.bf16.mxu1 %v1093_v5  ;;  %v1101_v13 = vld [vmem:[#allocation2 + $0xe0] sm:$0xff]   ;;  %v1105_v17 = vld [vmem:[#allocation2 + $0xd8] sm:$0xff]   ;;  %v1108_v20 = vld [vmem:[#allocation2 + $0x50] sm:$0xff]   ;;  %p1197_p8 = por %p1196_p7, %p1195_p6 }
  0x14   :  { %v1102_v14 = vld [vmem:[#allocation2 + $0x20] sm:$0xff]   ;;  %v1106_v18 = vld [vmem:[#allocation2 + $0x18] sm:$0xff]   ;;  %v1109_v21 = vld [vmem:[#allocation2 + $0xd0] sm:$0xff]  }
  0x15   :  { %968 = vmatpush3.bf16.msra.mxu0 %v1094_v6  ;;  %v1103_v15 = vld [vmem:[#allocation2 + $0xa0] sm:$0xff]   ;;  %v1107_v19 = vld [vmem:[#allocation2 + $0x98] sm:$0xff]   ;;  %v1110_v22 = vld [vmem:[#allocation2 + $0x10] sm:$0xff]   ;;  %p1198_p9 = pnand %p1197_p8, %p1191_p5 }
  0x16   :  { %990 = vmatpush3.bf16.msra.mxu1 %v1095_v7  ;;  %969 = vmatprep.subr.bf16.mxu0 %v1096_v8  ;;  %v1111_v23 = vld [vmem:[#allocation2 + $0x90] sm:$0xff]   ;;  %v1112_v24 = vld [vmem:[#allocation2 + $0x48] sm:$0xff]   ;;  %v1116_v28 = vld [vmem:[#allocation2 + $0x40] sm:$0xff]  }
  0x17   :  { %991 = vmatprep.subr.bf16.mxu1 %v1097_v9  ;;  %v1113_v25 = vld [vmem:[#allocation2 + $0xc8] sm:$0xff]   ;;  %v1117_v29 = vld [vmem:[#allocation2 + $0xc0] sm:$0xff]   ;;  %v1124_v38 = vld [vmem:[#allocation2 + $0x178] sm:$0xff]  }
  0x18   :  { %v1114_v26 = vld [vmem:[#allocation2 + $0x8] sm:$0xff]   ;;  %v1118_v30 = vld [vmem:[#allocation2] sm:$0xff]   ;;  %v1125_v39 = vld [vmem:[#allocation2 + $0x1f8] sm:$0xff]  }
  0x19   :  { %970 = vmatpush3.bf16.msra.mxu0 %v1098_v10  ;;  %v1115_v27 = vld [vmem:[#allocation2 + $0x88] sm:$0xff]   ;;  %v1119_v31 = vld [vmem:[#allocation2 + $0x80] sm:$0xff]   ;;  %v1126_v40 = vld [vmem:[#allocation2 + $0x138] sm:$0xff]  }
  0x1a   :  { %992 = vmatpush3.bf16.msra.mxu1 %v1099_v11  ;;  %971 = vmatprep.subr.bf16.mxu0 %v1100_v12  ;;  %v36_v32 = vld [vmem:[%s1298_s0] sm:$0xff]  ;;  %v37_v33 = vld [vmem:[%s1298_s0 + $0x8] sm:$0xff]  ;;  %v1127_v41 = vld [vmem:[#allocation2 + $0x1b8] sm:$0xff]  }
  0x1b   :  { %993 = vmatprep.subr.bf16.mxu1 %v1101_v13  ;;  %v884_v34 = vcombine.low %v36_v32, %v36_v32  ;;  %v885_v35 = vcombine.high %v36_v32, %v36_v32  ;;  %v886_v36 = vcombine.low %v37_v33, %v37_v33  ;;  %v887_v37 = vcombine.high %v37_v33, %v37_v33  ;;  %v1128_v42 = vld [vmem:[#allocation2 + $0x170] sm:$0xff]   ;;  %v1132_v46 = vld [vmem:[#allocation2 + $0x168] sm:$0xff]   ;;  %v1136_v50 = vld [vmem:[#allocation2 + $0x160] sm:$0xff]  }
  0x1c   :  { %v1129_v43 = vld [vmem:[#allocation2 + $0x1f0] sm:$0xff]   ;;  %v1133_v47 = vld [vmem:[#allocation2 + $0x1e8] sm:$0xff]   ;;  %v1137_v51 = vld [vmem:[#allocation2 + $0x1e0] sm:$0xff]   ;;  %v1217_v13 = vmov 0.0  }
  0x1d   :  { %972 = vmatpush3.bf16.msra.mxu0 %v1102_v14  ;;  %619 = vmatprep.mubr.bf16.mxu0 %v885_v35  ;;  %v1130_v44 = vld [vmem:[#allocation2 + $0x130] sm:$0xff]   ;;  %v1134_v48 = vld [vmem:[#allocation2 + $0x128] sm:$0xff]   ;;  %v1138_v52 = vld [vmem:[#allocation2 + $0x120] sm:$0xff]  }
  0x1e   :  { %994 = vmatpush3.bf16.msra.mxu1 %v1103_v15  ;;  %973 = vmatprep.subr.bf16.mxu0 %v1104_v16  ;;  %v1131_v45 = vld [vmem:[#allocation2 + $0x1b0] sm:$0xff]   ;;  %v1135_v49 = vld [vmem:[#allocation2 + $0x1a8] sm:$0xff]   ;;  %v1139_v53 = vld [vmem:[#allocation2 + $0x1a0] sm:$0xff]  }
  0x1f   :  { %995 = vmatprep.subr.bf16.mxu1 %v1105_v17  ;;  %659 = vmatprep.mubr.bf16.mxu1 %v887_v37  ;;  %v1140_v54 = vld [vmem:[#allocation2 + $0x158] sm:$0xff]   ;;  %v1144_v58 = vld [vmem:[#allocation2 + $0x150] sm:$0xff]   ;;  %v1148_v62 = vld [vmem:[#allocation2 + $0x148] sm:$0xff]  }
  0x20   :  { %v1141_v55 = vld [vmem:[#allocation2 + $0x1d8] sm:$0xff]   ;;  %v1145_v59 = vld [vmem:[#allocation2 + $0x1d0] sm:$0xff]   ;;  %v1149_v63 = vld [vmem:[#allocation2 + $0x1c8] sm:$0xff]  }
  0x21   :  { %974 = vmatpush3.bf16.msra.mxu0 %v1106_v18  ;;  %v1142_v56 = vld [vmem:[#allocation2 + $0x118] sm:$0xff]   ;;  %v1146_v60 = vld [vmem:[#allocation2 + $0x110] sm:$0xff]   ;;  %v1150_v0 = vld [vmem:[#allocation2 + $0x108] sm:$0xff]  }
  0x22   :  { %996 = vmatpush3.bf16.msra.mxu1 %v1107_v19  ;;  %975 = vmatprep.subr.bf16.mxu0 %v1108_v20  ;;  %v1143_v57 = vld [vmem:[#allocation2 + $0x198] sm:$0xff]   ;;  %v1147_v61 = vld [vmem:[#allocation2 + $0x190] sm:$0xff]   ;;  %v1151_v1 = vld [vmem:[#allocation2 + $0x188] sm:$0xff]  }
  0x23   :  { %997 = vmatprep.subr.bf16.mxu1 %v1109_v21  ;;  %v1152_v2 = vld [vmem:[#allocation2 + $0x140] sm:$0xff]   ;;  %v38_v6 = vld [vmem:[%s1298_s0 + $0x10] sm:$0xff]  ;;  %v39_v9 = vld [vmem:[%s1298_s0 + $0x18] sm:$0xff] }
  0x24   :  { %v1153_v3 = vld [vmem:[#allocation2 + $0x1c0] sm:$0xff]   ;;  %v888_v7 = vcombine.low %v38_v6, %v38_v6  ;;  %v889_v8 = vcombine.high %v38_v6, %v38_v6  ;;  %v890_v10 = vcombine.low %v39_v9, %v39_v9  ;;  %v891_v11 = vcombine.high %v39_v9, %v39_v9  ;;  %v1160_v12 = vld [vmem:[%s1301_s3 + $0x38] sm:$0xff]   ;;  %v1161_v14 = vld [vmem:[%s1301_s3 + $0x30] sm:$0xff]  }
  0x25   :  { %976 = vmatpush3.bf16.msra.mxu0 %v1110_v22  ;;  %v1154_v4 = vld [vmem:[#allocation2 + $0x100] sm:$0xff]   ;;  %v1162_v15 = vld [vmem:[%s1301_s3 + $0x28] sm:$0xff]   ;;  %v1164_v17 = vld [vmem:[%s1301_s3 + $0x18] sm:$0xff]  }
  0x26   :  { %998 = vmatpush3.bf16.msra.mxu1 %v1111_v23  ;;  %977 = vmatprep.subr.bf16.mxu0 %v1112_v24  ;;  %v1155_v5 = vld [vmem:[#allocation2 + $0x180] sm:$0xff]   ;;  %v1165_v18 = vld [vmem:[%s1301_s3 + $0x10] sm:$0xff]   ;;  %v1166_v19 = vld [vmem:[%s1301_s3 + $0x8] sm:$0xff]  }
  0x27   :  { %999 = vmatprep.subr.bf16.mxu1 %v1113_v25  ;;  %v1163_v16 = vld [vmem:[%s1301_s3 + $0x20] sm:$0xff]  }
  0x28   :  { %v1167_v20 = vld [vmem:[%s1301_s3] sm:$0xff]  }
  0x29   :  { %978 = vmatpush3.bf16.msra.mxu0 %v1114_v26 }
  0x2a   :  { %1000 = vmatpush3.bf16.msra.mxu1 %v1115_v27  ;;  %979 = vmatprep.subr.bf16.mxu0 %v1116_v28 }
  0x2b   :  { %1001 = vmatprep.subr.bf16.mxu1 %v1117_v29 }
  0x2d   :  { %980 = vmatpush3.bf16.msra.mxu0 %v1118_v30  ;;  %v883_v30 = vld [vmem:[%s1300_s2] ss:$0 sm:$0xff] }
  0x2e   :  { %1002 = vmatpush3.bf16.msra.mxu1 %v1119_v31  ;;  %1009 = vmatprep.subr.bf16.mxu0 %v1124_v38 }
  0x2f   :  { %1031 = vmatprep.subr.bf16.mxu1 %v1125_v39 }
  0x30   :  { %620 = vmatmul.mubr.bf16.vlgmr.msra.gmra.mxu0 %v884_v34 }
  0x31   :  { %660 = vmatmul.mubr.bf16.vlgmr.msra.gmra.mxu1 %v886_v36  ;;  %1010 = vmatpush3.bf16.msra.mxu0 %v1126_v40 }
  0x32   :  { %1032 = vmatpush3.bf16.msra.mxu1 %v1127_v41  ;;  %1011 = vmatprep.subr.bf16.mxu0 %v1128_v42 }
  0x33   :  { %1033 = vmatprep.subr.bf16.mxu1 %v1129_v43  ;;  %699 = vmatprep.mubr.bf16.mxu0 %v889_v8 }
  0x34   :  { %739 = vmatprep.mubr.bf16.mxu1 %v891_v11 }
  0x35   :  { %1012 = vmatpush3.bf16.msra.mxu0 %v1130_v44 }
  0x36   :  { %1034 = vmatpush3.bf16.msra.mxu1 %v1131_v45  ;;  %1013 = vmatprep.subr.bf16.mxu0 %v1132_v46 }
  0x37   :  { %1035 = vmatprep.subr.bf16.mxu1 %v1133_v47 }
  0x39   :  { %1014 = vmatpush3.bf16.msra.mxu0 %v1134_v48  ;;  %v956_v48 = vld [vmem:[%s1302_s4] ss:$0 sm:$0xff] }
  0x3a   :  { %1036 = vmatpush3.bf16.msra.mxu1 %v1135_v49  ;;  %1015 = vmatprep.subr.bf16.mxu0 %v1136_v50 }
  0x3b   :  { %1037 = vmatprep.subr.bf16.mxu1 %v1137_v51 }
  0x3d   :  { %1016 = vmatpush3.bf16.msra.mxu0 %v1138_v52 }
  0x3e   :  { %1038 = vmatpush3.bf16.msra.mxu1 %v1139_v53  ;;  %1017 = vmatprep.subr.bf16.mxu0 %v1140_v54 }
  0x3f   :  { %1039 = vmatprep.subr.bf16.mxu1 %v1141_v55  ;;  %v860_v55 = vlaneseq }
  0x41   :  { %1018 = vmatpush3.bf16.msra.mxu0 %v1142_v56  ;;  %v861_v56 = vand.u32 127, %v860_v55 }
  0x42   :  { %1040 = vmatpush3.bf16.msra.mxu1 %v1143_v57  ;;  %1019 = vmatprep.subr.bf16.mxu0 %v1144_v58 }
  0x43   :  { %1041 = vmatprep.subr.bf16.mxu1 %v1145_v59  ;;  %vm862_vm1 = vcmp.lt.s32.totalorder %v861_v56, 16 }
  0x45   :  { %1020 = vmatpush3.bf16.msra.mxu0 %v1146_v60 }
  0x46   :  { %1042 = vmatpush3.bf16.msra.mxu1 %v1147_v61  ;;  %1021 = vmatprep.subr.bf16.mxu0 %v1148_v62 }
  0x47   :  { %1043 = vmatprep.subr.bf16.mxu1 %v1149_v63 }
  0x49   :  { %1022 = vmatpush3.bf16.msra.mxu0 %v1150_v0 }
  0x4a   :  { %1044 = vmatpush3.bf16.msra.mxu1 %v1151_v1  ;;  %1023 = vmatprep.subr.bf16.mxu0 %v1152_v2 }
  0x4b   :  { %1045 = vmatprep.subr.bf16.mxu1 %v1153_v3 }
  0x4d   :  { %1024 = vmatpush3.bf16.msra.mxu0 %v1154_v4 }
  0x4e   :  { %1046 = vmatpush3.bf16.msra.mxu1 %v1155_v5  ;;  %1062 = vmatprep.subr.bf16.mxu0 %v1217_v13 }
  0x50   :  { %700 = vmatmul.mubr.bf16.vlgmr.msra.gmra.mxu0 %v888_v7 }
  0x51   :  { %740 = vmatmul.mubr.bf16.vlgmr.msra.gmra.mxu1 %v890_v10  ;;  %1063 = vmatpush3.bf16.msra.mxu0 %v1160_v12 }
  0x52   :  { %1064 = vmatprep.subr.bf16.mxu0 %v1217_v13  ;;  %1078 = vmatprep.mubr.msk.bf16.mxu0 %vm1218_vm0, %v1217_v13 }
  0x55   :  { %1065 = vmatpush3.bf16.msra.mxu0 %v1161_v14 }
  0x56   :  { %1066 = vmatprep.subr.bf16.mxu0 %v1217_v13 }
  0x59   :  { %1067 = vmatpush3.bf16.msra.mxu0 %v1162_v15 }
  0x5a   :  { %1068 = vmatprep.subr.bf16.mxu0 %v1217_v13 }
  0x5d   :  { %1069 = vmatpush3.bf16.msra.mxu0 %v1163_v16 }
  0x5e   :  { %1070 = vmatprep.subr.bf16.mxu0 %v1217_v13 }
  0x61   :  { %1071 = vmatpush3.bf16.msra.mxu0 %v1164_v17 }
  0x62   :  { %1072 = vmatprep.subr.bf16.mxu0 %v1217_v13 }
  0x65   :  { %1073 = vmatpush3.bf16.msra.mxu0 %v1165_v18 }
  0x66   :  { %1074 = vmatprep.subr.bf16.mxu0 %v1217_v13 }
  0x69   :  { %1075 = vmatpush3.bf16.msra.mxu0 %v1166_v19 }
  0x6a   :  { %1076 = vmatprep.subr.bf16.mxu0 %v1217_v13 }
  0x6d   :  { %1077 = vmatpush3.bf16.msra.mxu0 %v1167_v20 }
  0xf0   :  { %v981_v21 = vpop.f32.mrf.mxu0 }
  0xf1   :  { %v1003_v22 = vpop.f32.mrf.mxu1 }
  0xf2   :  { %v982_v23 = vpop.f32.mrf.mxu0 }
  0xf3   :  { %v1004_v24 = vpop.f32.mrf.mxu1  ;;  %v983_v29 = vadd.f32 %v982_v23, %v981_v21 }
  0xf4   :  { %v984_v25 = vpop.f32.mrf.mxu0  ;;  %v1005_v32 = vadd.f32 %v1004_v24, %v1003_v22 }
  0xf5   :  { %v1006_v26 = vpop.f32.mrf.mxu1  ;;  %v622_v31 = vadd.f32 %v983_v29, %v883_v30 }
  0xf6   :  { %v985_v27 = vpop.f32.mrf.mxu0 }
  0xf7   :  { %v1007_v28 = vpop.f32.mrf.mxu1  ;;  %v662_v37 = vadd.f32 %v1005_v32, %v622_v31 }
 0x110   :  { %v1025_v33 = vpop.f32.mrf.mxu0 }
 0x111   :  { %v1047_v34 = vpop.f32.mrf.mxu1 }
 0x112   :  { %v1026_v35 = vpop.f32.mrf.mxu0 }
 0x113   :  { %v1048_v36 = vpop.f32.mrf.mxu1  ;;  %v1027_v38 = vadd.f32 %v1026_v35, %v1025_v33 }
 0x114   :  { %v1028_v39 = vpop.f32.mrf.mxu0  ;;  %v1049_v42 = vadd.f32 %v1048_v36, %v1047_v34 }
 0x115   :  { %v1050_v40 = vpop.f32.mrf.mxu1  ;;  %v702_v41 = vadd.f32 %v1027_v38, %v662_v37 }
 0x116   :  { %v1029_v43 = vpop.f32.mrf.mxu0 }
 0x117   :  { %v1051_v44 = vpop.f32.mrf.mxu1  ;;  %v742_v45 = vadd.f32 %v1049_v42, %v702_v41 }
 0x119   :  { %v747_v46 = vmax.f32 %v742_v45, 0.0 }
 0x11b   :  { %v748_v47 = vpack.c.bf16 %v747_v46, %v747_v46 }
 0x11d   :  { %1079 = vmatmul.mubr.bf16.vlgmr.msra.gmra.mxu0 %v748_v47 }
 0x1dd   :  { %v854_v49 = vpop.f32.mrf.mxu0 }
 0x1de   :  { %v855_v50 = vadd.f32 %v956_v48, %v854_v49 }
 0x1df   :  { %v1080_v51 = vpop.f32.mrf.mxu0 }
 0x1e0   :  { %v863_v52 = vmul.f32 1.442695, %v855_v50 }
 0x1e1   :  { %v857_v53 = vpop.f32.mrf.mxu0 }
 0x1e2   :  { %1168 = vpow2.f32 %v863_v52 }
 0x1e3   :  { %v1081_v54 = vpop.f32.mrf.mxu0 }
 0x1ef   :  { %v1169_v57 = vpop.eup %1168 }
 0x1f0   :  { %v865_v58 = vsel %vm862_vm1, %v855_v50, %v1169_v57 }
 0x1f1   :  { %867 = vst.msk [vmem:[#allocation5] sm:$0xff] %vm866_vm2, %v865_v58 }
 0x1f2   :  { %1201 = shalt.err (!%p1198_p9)
}
 0x1f3   :  { %877 = dma.vmem_to_hbm [thread:$0]  %s875_s1, 128, %s1303_s5, [#allocation4]  }
 0x1f4   :  { %1212 = dma.done.wait [#allocation4], 128  }
 0x1f5   :  { %1213 = vsyncadd [#allocation4], 4294967168 }
 0x1f6   :  { %881 = vsyncpa [#allocation3], 1 }
 0x1f7   :  { %882 = vsyncpa [#allocation4], 1 }

</bundles_post_ra>
